<compile_context>
chip_gen: v6e
topology: v6e:2x2x1
jax: 0.10.0
libtpu: 0.0.40
codegen_flags: <defaults>
</compile_context>

<pallas_src>
import jax
import jax.numpy as jnp
from jax.experimental import pallas as pl
from jax.experimental.pallas import tpu as pltpu

# ----------------------------- config (scaled-down BERT) -----------------------------
BATCH = 2
SEQ = 8
HIDDEN = 32          # stands in for 768
HEADS = 2            # stands in for 12
DHEAD = HIDDEN // HEADS
INTER = 64           # stands in for 3072
LAYERS = 2           # stands in for 12
VOCAB = 128
MAXPOS = 16
TYPE_VOCAB = 2
NCLASSES = 4         # stands in for len(le.classes_)
LN_EPS = 1e-12       # BERT layer-norm eps
MASK_BIAS = -10000.0 # HF BertModel additive mask value


# ----------------------------- shared helpers (work in-kernel and in JAX) -----------------------------
def _layernorm(x, gamma, beta):
    mu = jnp.mean(x, axis=-1, keepdims=True)
    var = jnp.mean((x - mu) ** 2, axis=-1, keepdims=True)
    return (x - mu) * jax.lax.rsqrt(var + LN_EPS) * gamma + beta


def _gelu(x):
    # TODO(synk): HF "gelu" is erf-based; tanh approximation used for guaranteed TPU lowering.
    return 0.5 * x * (1.0 + jnp.tanh(0.7978845608028654 * (x + 0.044715 * x * x * x)))


# ----------------------------- fused encoder kernel -----------------------------
def _encoder_kernel(bias_ref, emb_hbm,
                    wqkv_ref, bqkv_ref, wo_ref, bo_ref, ln1g_ref, ln1b_ref,
                    wi_ref, bi_ref, wo2_ref, bo2_ref, ln2g_ref, ln2b_ref,
                    cls_ref, h_ref, qkv_ref, emb_sem):
    """One grid step == one encoder layer; hidden state stays resident in the h_ref scratch."""
    layer = pl.program_id(0)

    # Seed the resident hidden state once: single manual DMA of the (already
    # LayerNorm'ed) embeddings from HBM, instead of pinning them in VMEM for all layers.
    @pl.when(layer == 0)
    def _():
        cp = pltpu.make_async_copy(emb_hbm, h_ref, emb_sem.at[0])
        cp.start()
        cp.wait()

    h = h_ref[...]                                                   # (B*S, H) f32
    h_bf = h.astype(jnp.bfloat16)                                    # cast exactly once per layer

    # ---- fused QKV projection: one MXU pass; 1/sqrt(Dh) pre-folded into the Q columns ----
    qkv_ref[...] = (jnp.dot(h_bf, wqkv_ref[0], preferred_element_type=jnp.float32)
                    + bqkv_ref[0]).astype(jnp.bfloat16)
    qkv = qkv_ref[...]                                               # (B*S, 3H) bf16
    bias = bias_ref[...]                                             # (B*S, B*S) block-diag + padding bias
    wo = wo_ref[0]                                                   # (H, H) bf16

    # ---- multi-head attention over the flattened token axis ----
    # Cross-sequence pairs are masked by the additive bias, so every matmul is a
    # single 2D MXU op (no per-batch unroll, no concatenate).  Per-head output
    # projection folded in: ctx @ Wo == sum_h ctx_h @ Wo[h*Dh:(h+1)*Dh, :].
    # TODO(synk): at real HEADS=12 / S=512 use a head grid axis or head-major
    # lane-dense QKV layout and per-sequence score tiles.
    attn = jnp.zeros((BATCH * SEQ, HIDDEN), jnp.float32)
    for hd in range(HEADS):
        c = hd * DHEAD
        q = qkv[:, c:c + DHEAD]                                      # bf16, already scaled
        k = qkv[:, HIDDEN + c:HIDDEN + c + DHEAD]
        v = qkv[:, 2 * HIDDEN + c:2 * HIDDEN + c + DHEAD]
        s = jax.lax.dot_general(q, k, (((1,), (1,)), ((), ())),
                                preferred_element_type=jnp.float32) + bias
        s = s - jnp.max(s, axis=-1, keepdims=True)
        p = jnp.exp(s)
        p = p * pl.reciprocal(jnp.sum(p, axis=-1, keepdims=True), approx=True)
        ctx = jnp.dot(p.astype(jnp.bfloat16), v,
                      preferred_element_type=jnp.float32)            # (B*S, Dh)
        attn = attn + jnp.dot(ctx.astype(jnp.bfloat16), wo[c:c + DHEAD, :],
                              preferred_element_type=jnp.float32)    # (B*S, H)

    h1 = _layernorm(attn + bo_ref[0] + h, ln1g_ref[0], ln1b_ref[0])

    # ---- feed-forward: up-proj + GELU + down-proj + add&LN, all resident in VMEM ----
    # TODO(synk): at real INTER=3072 tile this along INTER instead of materializing (B*S, INTER).
    h1_bf = h1.astype(jnp.bfloat16)                                  # cast exactly once
    ff = jnp.dot(h1_bf, wi_ref[0], preferred_element_type=jnp.float32) + bi_ref[0]
    ff = _gelu(ff)
    ff = jnp.dot(ff.astype(jnp.bfloat16), wo2_ref[0],
                 preferred_element_type=jnp.float32) + bo2_ref[0]
    h_new = _layernorm(ff + h1, ln2g_ref[0], ln2b_ref[0])
    h_ref[...] = h_new

    # Only the [CLS] rows (row b*S of each sequence) ever leave the kernel.
    @pl.when(layer == pl.num_programs(0) - 1)
    def _():
        cls_ref[...] = jnp.concatenate(
            [h_new[b * SEQ:b * SEQ + 1, :] for b in range(BATCH)], axis=0)


# ----------------------------- parameter init -----------------------------
def init_params(key):
    keys = iter(jax.random.split(key, 16))

    def dense(shape):
        return jax.random.normal(next(keys), shape, jnp.float32) * 0.02

    # Fold 1/sqrt(Dh) into the Q columns of the fused QKV weight AND bias at init,
    # so the kernel never multiplies Q by the scale.
    scale = 1.0 / (DHEAD ** 0.5)
    wqkv = dense((LAYERS, HIDDEN, 3 * HIDDEN))
    bqkv = jnp.zeros((LAYERS, 1, 3 * HIDDEN), jnp.float32)
    wqkv = wqkv.at[:, :, :HIDDEN].multiply(scale)
    bqkv = bqkv.at[:, :, :HIDDEN].multiply(scale)

    return {
        # embeddings (f32; gathered + LayerNorm'ed in JAX)
        "word_emb": dense((VOCAB, HIDDEN)),
        "pos_emb": dense((MAXPOS, HIDDEN)),
        "type_emb": dense((TYPE_VOCAB, HIDDEN)),
        "emb_ln_g": jnp.ones((1, HIDDEN), jnp.float32),
        "emb_ln_b": jnp.zeros((1, HIDDEN), jnp.float32),
        # per-layer weights stacked on a leading layer axis; matmul weights in bf16
        "wqkv": wqkv.astype(jnp.bfloat16),
        "bqkv": bqkv,
        "wo": dense((LAYERS, HIDDEN, HIDDEN)).astype(jnp.bfloat16),
        "bo": jnp.zeros((LAYERS, 1, HIDDEN), jnp.float32),
        "ln1_g": jnp.ones((LAYERS, 1, HIDDEN), jnp.float32),
        "ln1_b": jnp.zeros((LAYERS, 1, HIDDEN), jnp.float32),
        "wi": dense((LAYERS, HIDDEN, INTER)).astype(jnp.bfloat16),
        "bi": jnp.zeros((LAYERS, 1, INTER), jnp.float32),
        "wo2": dense((LAYERS, INTER, HIDDEN)).astype(jnp.bfloat16),
        "bo2": jnp.zeros((LAYERS, 1, HIDDEN), jnp.float32),
        "ln2_g": jnp.ones((LAYERS, 1, HIDDEN), jnp.float32),
        "ln2_b": jnp.zeros((LAYERS, 1, HIDDEN), jnp.float32),
        # classifier head (kept as a plain-JAX matmul; 2x32x4 is not worth a launch)
        "cls_w": dense((HIDDEN, NCLASSES)),
        "cls_b": jnp.zeros((NCLASSES,), jnp.float32),
    }


# ----------------------------- forward (BertClassifier.forward) -----------------------------
def bert_classifier_forward(params, X, A):
    B, S = X.shape
    BS = B * S

    # --- embeddings: gather + sum + LayerNorm as cheap JAX glue (read once by the kernel) ---
    tok = jnp.take(params["word_emb"], X, axis=0)                    # (B, S, H)
    pos = params["pos_emb"][:S][None, :, :]                          # (1, S, H)
    typ = params["type_emb"][0][None, None, :]                       # token_type_ids=None -> all zeros
    emb = (tok + pos + typ).reshape(BS, HIDDEN)                      # (B*S, H)
    emb = _layernorm(emb, params["emb_ln_g"], params["emb_ln_b"])

    # --- additive attention bias over the flattened token axis ---
    # HF semantics: 0 for attended, -10000 for padding; additionally -10000 for
    # cross-sequence pairs so a single 2D score matrix stays sequence-block-diagonal.
    seq_id = jnp.repeat(jnp.arange(B), S)                            # (B*S,)
    key_pad = ((1.0 - A.astype(jnp.float32)) * MASK_BIAS).reshape(BS)
    attn_bias = jnp.where(seq_id[:, None] == seq_id[None, :],
                          key_pad[None, :], MASK_BIAS)               # (B*S, B*S)

    def fixed(shape):
        return pl.BlockSpec(shape, lambda l, _n=len(shape): (0,) * _n)

    def stacked(d1, d2):
        return pl.BlockSpec((1, d1, d2), lambda l: (l, 0, 0))

    cls = pl.pallas_call(
        _encoder_kernel,
        grid=(LAYERS,),
        in_specs=[
            fixed((BS, BS)),                    # attention bias (tiny, resident)
            pl.BlockSpec(memory_space=pl.ANY),  # embeddings stay in HBM; one DMA at layer 0
            stacked(HIDDEN, 3 * HIDDEN),        # wqkv (scale pre-folded into Q columns)
            stacked(1, 3 * HIDDEN),             # bqkv
            stacked(HIDDEN, HIDDEN),            # wo
            stacked(1, HIDDEN),                 # bo
            stacked(1, HIDDEN),                 # ln1 gamma
            stacked(1, HIDDEN),                 # ln1 beta
            stacked(HIDDEN, INTER),             # wi
            stacked(1, INTER),                  # bi
            stacked(INTER, HIDDEN),             # wo2
            stacked(1, HIDDEN),                 # bo2
            stacked(1, HIDDEN),                 # ln2 gamma
            stacked(1, HIDDEN),                 # ln2 beta
        ],
        out_specs=pl.BlockSpec((B, HIDDEN), lambda l: (0, 0)),
        out_shape=jax.ShapeDtypeStruct((B, HIDDEN), jnp.float32),    # only the [CLS] rows
        scratch_shapes=[
            pltpu.VMEM((BS, HIDDEN), jnp.float32),       # resident hidden state
            pltpu.VMEM((BS, 3 * HIDDEN), jnp.bfloat16),  # fused QKV activations (bf16)
            pltpu.SemaphoreType.DMA((1,)),               # embedding seed DMA
        ],
        compiler_params=pltpu.CompilerParams(
            dimension_semantics=("arbitrary",)),   # layer axis carries the hidden state
        # TODO(synk): at real scale add a "parallel" batch-tile axis (v7x dual TC),
        # set vmem_limit_bytes per generation, and pl.Buffered(1) on the big weights for v7x.
    )(attn_bias, emb,
      params["wqkv"], params["bqkv"], params["wo"], params["bo"],
      params["ln1_g"], params["ln1_b"],
      params["wi"], params["bi"], params["wo2"], params["bo2"],
      params["ln2_g"], params["ln2_b"])

    # --- classifier on the [CLS] token; the 2x32x4 matmul stays in plain JAX ---
    logits = cls @ params["cls_w"] + params["cls_b"]                 # (B, NCLASSES)
    return logits


if __name__ == "__main__":
    params = init_params(jax.random.PRNGKey(0))
    X = jax.random.randint(jax.random.PRNGKey(1), (BATCH, SEQ), 0, VOCAB, dtype=jnp.int32)
    # attention mask: sample 0 fully attended, sample 1 has 2 padding tokens
    A = jnp.array([[1] * SEQ, [1] * (SEQ - 2) + [0, 0]], dtype=jnp.int32)

    logits = jax.jit(bert_classifier_forward)(params, X, A)
    jax.block_until_ready(logits)
    assert logits.shape == (BATCH, NCLASSES) and logits.dtype == jnp.float32
    print("KERNEL_OK")
</pallas_src>

<mosaic_0001>
module attributes {stable_mosaic.version = 11 : i64} {
  func.func @_encoder_kernel(%arg0: i32, %arg1: memref<16x16xf32, #tpu.memory_space<vmem>>, %arg2: memref<16x32xf32, #tpu.memory_space<any>>, %arg3: memref<1x32x96xbf16, #tpu.memory_space<vmem>>, %arg4: memref<1x1x96xf32, #tpu.memory_space<vmem>>, %arg5: memref<1x32x32xbf16, #tpu.memory_space<vmem>>, %arg6: memref<1x1x32xf32, #tpu.memory_space<vmem>>, %arg7: memref<1x1x32xf32, #tpu.memory_space<vmem>>, %arg8: memref<1x1x32xf32, #tpu.memory_space<vmem>>, %arg9: memref<1x32x64xbf16, #tpu.memory_space<vmem>>, %arg10: memref<1x1x64xf32, #tpu.memory_space<vmem>>, %arg11: memref<1x64x32xbf16, #tpu.memory_space<vmem>>, %arg12: memref<1x1x32xf32, #tpu.memory_space<vmem>>, %arg13: memref<1x1x32xf32, #tpu.memory_space<vmem>>, %arg14: memref<1x1x32xf32, #tpu.memory_space<vmem>>, %arg15: memref<2x32xf32, #tpu.memory_space<vmem>>, %arg16: memref<16x32xf32, #tpu.memory_space<vmem>>, %arg17: memref<16x96xbf16, #tpu.memory_space<vmem>>, %arg18: memref<1x!tpu.dma_semaphore, #tpu.memory_space<semaphore_mem>>) attributes {dimension_semantics = [#tpu.dimension_semantics<arbitrary>], iteration_bounds = array<i64: 2>, scalar_prefetch = 0 : i64, scratch_operands = 3 : i64, tpu.core_type = #tpu.core_type<tc>, window_params = [{pipeline_mode = #tpu.pipeline_mode<synchronous>, transform_indices = @transform_0, window_bounds = array<i64: 16, 16>}, {}, {transform_indices = @transform_2, window_bounds = array<i64: 1, 32, 96>}, {transform_indices = @transform_3, window_bounds = array<i64: 1, 1, 96>}, {transform_indices = @transform_4, window_bounds = array<i64: 1, 32, 32>}, {transform_indices = @transform_5, window_bounds = array<i64: 1, 1, 32>}, {transform_indices = @transform_6, window_bounds = array<i64: 1, 1, 32>}, {transform_indices = @transform_7, window_bounds = array<i64: 1, 1, 32>}, {transform_indices = @transform_8, window_bounds = array<i64: 1, 32, 64>}, {transform_indices = @transform_9, window_bounds = array<i64: 1, 1, 64>}, {transform_indices = @transform_10, window_bounds = array<i64: 1, 64, 32>}, {transform_indices = @transform_11, window_bounds = array<i64: 1, 1, 32>}, {transform_indices = @transform_12, window_bounds = array<i64: 1, 1, 32>}, {transform_indices = @transform_13, window_bounds = array<i64: 1, 1, 32>}, {pipeline_mode = #tpu.pipeline_mode<synchronous>, transform_indices = @transform_14, window_bounds = array<i64: 2, 32>}]} {
    %c0_i32 = arith.constant 0 : i32
    %0 = arith.cmpi eq, %arg0, %c0_i32 : i32
    %1 = arith.extui %0 : i1 to i32
    %c0_i32_0 = arith.constant 0 : i32
    %2 = arith.cmpi ne, %1, %c0_i32_0 : i32
    scf.if %2 {
      %c0_i32_74 = arith.constant 0 : i32
      %152 = tpu.memref_slice %arg18[%c0_i32_74] : memref<1x!tpu.dma_semaphore, #tpu.memory_space<semaphore_mem>> -> memref<1x!tpu.dma_semaphore, #tpu.memory_space<semaphore_mem>>
      %153 = tpu.memref_squeeze %152 : memref<1x!tpu.dma_semaphore, #tpu.memory_space<semaphore_mem>> -> memref<!tpu.dma_semaphore, #tpu.memory_space<semaphore_mem>>
      tpu.enqueue_dma source(%arg2 : memref<16x32xf32, #tpu.memory_space<any>>) target(%arg16 : memref<16x32xf32, #tpu.memory_space<vmem>>) target_semaphore(%153 : memref<!tpu.dma_semaphore, #tpu.memory_space<semaphore_mem>>)
      %c0_i32_75 = arith.constant 0 : i32
      %154 = tpu.memref_slice %arg18[%c0_i32_75] : memref<1x!tpu.dma_semaphore, #tpu.memory_space<semaphore_mem>> -> memref<1x!tpu.dma_semaphore, #tpu.memory_space<semaphore_mem>>
      %155 = tpu.memref_squeeze %154 : memref<1x!tpu.dma_semaphore, #tpu.memory_space<semaphore_mem>> -> memref<!tpu.dma_semaphore, #tpu.memory_space<semaphore_mem>>
      tpu.wait_dma2 semaphore(%155 : memref<!tpu.dma_semaphore, #tpu.memory_space<semaphore_mem>>) src(%arg2 : memref<16x32xf32, #tpu.memory_space<any>>) dst(%arg16 : memref<16x32xf32, #tpu.memory_space<vmem>>)
    } else {
    }
    %c0 = arith.constant 0 : index
    %c0_1 = arith.constant 0 : index
    %3 = vector.load %arg16[%c0, %c0_1] : memref<16x32xf32, #tpu.memory_space<vmem>>, vector<16x32xf32>
    %4 = arith.truncf %3 : vector<16x32xf32> to vector<16x32xbf16>
    %c0_2 = arith.constant 0 : index
    %c0_3 = arith.constant 0 : index
    %c0_4 = arith.constant 0 : index
    %5 = vector.load %arg3[%c0_2, %c0_3, %c0_4] : memref<1x32x96xbf16, #tpu.memory_space<vmem>>, vector<1x32x96xbf16>
    %6 = vector.shape_cast %5 : vector<1x32x96xbf16> to vector<32x96xbf16>
    %cst = arith.constant dense<0.000000e+00> : vector<16x96xf32>
    %7 = tpu.matmul %4, %6, %cst {dimension_numbers = #tpu.dot_dimension_numbers<[1], [0], [0], [1], [0, 0, 1, 1], [], []>} : vector<16x32xbf16>, vector<32x96xbf16>, vector<16x96xf32> -> vector<16x96xf32>
    %c0_5 = arith.constant 0 : index
    %c0_6 = arith.constant 0 : index
    %c0_7 = arith.constant 0 : index
    %8 = vector.load %arg4[%c0_5, %c0_6, %c0_7] : memref<1x1x96xf32, #tpu.memory_space<vmem>>, vector<1x1x96xf32>
    %9 = vector.shape_cast %8 : vector<1x1x96xf32> to vector<1x96xf32>
    %10 = vector.broadcast %9 : vector<1x96xf32> to vector<16x96xf32>
    %11 = arith.addf %7, %10 : vector<16x96xf32>
    %12 = arith.truncf %11 : vector<16x96xf32> to vector<16x96xbf16>
    %c0_8 = arith.constant 0 : index
    %c0_9 = arith.constant 0 : index
    %13 = vector.load %arg17[%c0_8, %c0_9] : memref<16x96xbf16, #tpu.memory_space<vmem>>, vector<16x96xbf16>
    tpu.vector_store %arg17[%c0_8, %c0_9], %12 {strides = array<i32>} : memref<16x96xbf16, #tpu.memory_space<vmem>>, vector<16x96xbf16>,
    %c0_10 = arith.constant 0 : index
    %c0_11 = arith.constant 0 : index
    %14 = vector.load %arg17[%c0_10, %c0_11] : memref<16x96xbf16, #tpu.memory_space<vmem>>, vector<16x96xbf16>
    %c0_12 = arith.constant 0 : index
    %c0_13 = arith.constant 0 : index
    %15 = vector.load %arg1[%c0_12, %c0_13] : memref<16x16xf32, #tpu.memory_space<vmem>>, vector<16x16xf32>
    %c0_14 = arith.constant 0 : index
    %c0_15 = arith.constant 0 : index
    %c0_16 = arith.constant 0 : index
    %16 = vector.load %arg5[%c0_14, %c0_15, %c0_16] : memref<1x32x32xbf16, #tpu.memory_space<vmem>>, vector<1x32x32xbf16>
    %17 = vector.shape_cast %16 : vector<1x32x32xbf16> to vector<32x32xbf16>
    %cst_17 = arith.constant 0.000000e+00 : f32
    %18 = vector.broadcast %cst_17 : f32 to vector<16x32xf32>
    %19 = vector.extract_strided_slice %14 {offsets = [0, 0], sizes = [16, 16], strides = [1, 1]} : vector<16x96xbf16> to vector<16x16xbf16>
    %20 = vector.extract_strided_slice %14 {offsets = [0, 32], sizes = [16, 16], strides = [1, 1]} : vector<16x96xbf16> to vector<16x16xbf16>
    %21 = vector.extract_strided_slice %14 {offsets = [0, 64], sizes = [16, 16], strides = [1, 1]} : vector<16x96xbf16> to vector<16x16xbf16>
    %cst_18 = arith.constant dense<0.000000e+00> : vector<16x16xf32>
    %22 = tpu.matmul %19, %20, %cst_18 {dimension_numbers = #tpu.dot_dimension_numbers<[1], [1], [0], [0], [0, 0, 1, 0], [], []>} : vector<16x16xbf16>, vector<16x16xbf16>, vector<16x16xf32> -> vector<16x16xf32>
    %23 = arith.addf %22, %15 : vector<16x16xf32>
    %cst_19 = arith.constant dense<0xFF800000> : vector<16xf32>
    %24 = vector.multi_reduction <maximumf>, %23, %cst_19 [1] : vector<16x16xf32> to vector<16xf32>
    %25 = vector.shape_cast %24 : vector<16xf32> to vector<16x1xf32>
    %26 = vector.broadcast %25 : vector<16x1xf32> to vector<16x16xf32>
    %27 = arith.subf %23, %26 : vector<16x16xf32>
    %28 = math.exp %27 : vector<16x16xf32>
    %cst_20 = arith.constant dense<0.000000e+00> : vector<16xf32>
    %29 = vector.multi_reduction <add>, %28, %cst_20 [1] : vector<16x16xf32> to vector<16xf32>
    %30 = vector.shape_cast %29 : vector<16xf32> to vector<16x1xf32>
    %31 = tpu.reciprocal %30 {approx = true} : vector<16x1xf32> -> vector<16x1xf32>
    %32 = vector.broadcast %31 : vector<16x1xf32> to vector<16x16xf32>
    %33 = arith.mulf %28, %32 : vector<16x16xf32>
    %34 = arith.truncf %33 : vector<16x16xf32> to vector<16x16xbf16>
    %cst_21 = arith.constant dense<0.000000e+00> : vector<16x16xf32>
    %35 = tpu.matmul %34, %21, %cst_21 {dimension_numbers = #tpu.dot_dimension_numbers<[1], [0], [0], [1], [0, 0, 1, 1], [], []>} : vector<16x16xbf16>, vector<16x16xbf16>, vector<16x16xf32> -> vector<16x16xf32>
    %36 = arith.truncf %35 : vector<16x16xf32> to vector<16x16xbf16>
    %37 = vector.extract_strided_slice %17 {offsets = [0, 0], sizes = [16, 32], strides = [1, 1]} : vector<32x32xbf16> to vector<16x32xbf16>
    %cst_22 = arith.constant dense<0.000000e+00> : vector<16x32xf32>
    %38 = tpu.matmul %36, %37, %cst_22 {dimension_numbers = #tpu.dot_dimension_numbers<[1], [0], [0], [1], [0, 0, 1, 1], [], []>} : vector<16x16xbf16>, vector<16x32xbf16>, vector<16x32xf32> -> vector<16x32xf32>
    %39 = arith.addf %18, %38 : vector<16x32xf32>
    %40 = vector.extract_strided_slice %14 {offsets = [0, 16], sizes = [16, 16], strides = [1, 1]} : vector<16x96xbf16> to vector<16x16xbf16>
    %41 = vector.extract_strided_slice %14 {offsets = [0, 48], sizes = [16, 16], strides = [1, 1]} : vector<16x96xbf16> to vector<16x16xbf16>
    %42 = vector.extract_strided_slice %14 {offsets = [0, 80], sizes = [16, 16], strides = [1, 1]} : vector<16x96xbf16> to vector<16x16xbf16>
    %cst_23 = arith.constant dense<0.000000e+00> : vector<16x16xf32>
    %43 = tpu.matmul %40, %41, %cst_23 {dimension_numbers = #tpu.dot_dimension_numbers<[1], [1], [0], [0], [0, 0, 1, 0], [], []>} : vector<16x16xbf16>, vector<16x16xbf16>, vector<16x16xf32> -> vector<16x16xf32>
    %44 = arith.addf %43, %15 : vector<16x16xf32>
    %cst_24 = arith.constant dense<0xFF800000> : vector<16xf32>
    %45 = vector.multi_reduction <maximumf>, %44, %cst_24 [1] : vector<16x16xf32> to vector<16xf32>
    %46 = vector.shape_cast %45 : vector<16xf32> to vector<16x1xf32>
    %47 = vector.broadcast %46 : vector<16x1xf32> to vector<16x16xf32>
    %48 = arith.subf %44, %47 : vector<16x16xf32>
    %49 = math.exp %48 : vector<16x16xf32>
    %cst_25 = arith.constant dense<0.000000e+00> : vector<16xf32>
    %50 = vector.multi_reduction <add>, %49, %cst_25 [1] : vector<16x16xf32> to vector<16xf32>
    %51 = vector.shape_cast %50 : vector<16xf32> to vector<16x1xf32>
    %52 = tpu.reciprocal %51 {approx = true} : vector<16x1xf32> -> vector<16x1xf32>
    %53 = vector.broadcast %52 : vector<16x1xf32> to vector<16x16xf32>
    %54 = arith.mulf %49, %53 : vector<16x16xf32>
    %55 = arith.truncf %54 : vector<16x16xf32> to vector<16x16xbf16>
    %cst_26 = arith.constant dense<0.000000e+00> : vector<16x16xf32>
    %56 = tpu.matmul %55, %42, %cst_26 {dimension_numbers = #tpu.dot_dimension_numbers<[1], [0], [0], [1], [0, 0, 1, 1], [], []>} : vector<16x16xbf16>, vector<16x16xbf16>, vector<16x16xf32> -> vector<16x16xf32>
    %57 = arith.truncf %56 : vector<16x16xf32> to vector<16x16xbf16>
    %58 = vector.extract_strided_slice %17 {offsets = [16, 0], sizes = [16, 32], strides = [1, 1]} : vector<32x32xbf16> to vector<16x32xbf16>
    %cst_27 = arith.constant dense<0.000000e+00> : vector<16x32xf32>
    %59 = tpu.matmul %57, %58, %cst_27 {dimension_numbers = #tpu.dot_dimension_numbers<[1], [0], [0], [1], [0, 0, 1, 1], [], []>} : vector<16x16xbf16>, vector<16x32xbf16>, vector<16x32xf32> -> vector<16x32xf32>
    %60 = arith.addf %39, %59 : vector<16x32xf32>
    %c0_28 = arith.constant 0 : index
    %c0_29 = arith.constant 0 : index
    %c0_30 = arith.constant 0 : index
    %61 = vector.load %arg6[%c0_28, %c0_29, %c0_30] : memref<1x1x32xf32, #tpu.memory_space<vmem>>, vector<1x1x32xf32>
    %62 = vector.shape_cast %61 : vector<1x1x32xf32> to vector<1x32xf32>
    %63 = vector.broadcast %62 : vector<1x32xf32> to vector<16x32xf32>
    %64 = arith.addf %60, %63 : vector<16x32xf32>
    %65 = arith.addf %64, %3 : vector<16x32xf32>
    %c0_31 = arith.constant 0 : index
    %c0_32 = arith.constant 0 : index
    %c0_33 = arith.constant 0 : index
    %66 = vector.load %arg7[%c0_31, %c0_32, %c0_33] : memref<1x1x32xf32, #tpu.memory_space<vmem>>, vector<1x1x32xf32>
    %67 = vector.shape_cast %66 : vector<1x1x32xf32> to vector<1x32xf32>
    %c0_34 = arith.constant 0 : index
    %c0_35 = arith.constant 0 : index
    %c0_36 = arith.constant 0 : index
    %68 = vector.load %arg8[%c0_34, %c0_35, %c0_36] : memref<1x1x32xf32, #tpu.memory_space<vmem>>, vector<1x1x32xf32>
    %69 = vector.shape_cast %68 : vector<1x1x32xf32> to vector<1x32xf32>
    %cst_37 = arith.constant dense<0.000000e+00> : vector<16xf32>
    %70 = vector.multi_reduction <add>, %65, %cst_37 [1] : vector<16x32xf32> to vector<16xf32>
    %71 = vector.shape_cast %70 : vector<16xf32> to vector<16x1xf32>
    %cst_38 = arith.constant 3.200000e+01 : f32
    %72 = vector.broadcast %cst_38 : f32 to vector<16x1xf32>
    %73 = arith.divf %71, %72 : vector<16x1xf32>
    %74 = vector.broadcast %73 : vector<16x1xf32> to vector<16x32xf32>
    %75 = arith.subf %65, %74 : vector<16x32xf32>
    %76 = arith.mulf %75, %75 : vector<16x32xf32>
    %cst_39 = arith.constant dense<0.000000e+00> : vector<16xf32>
    %77 = vector.multi_reduction <add>, %76, %cst_39 [1] : vector<16x32xf32> to vector<16xf32>
    %78 = vector.shape_cast %77 : vector<16xf32> to vector<16x1xf32>
    %cst_40 = arith.constant 3.200000e+01 : f32
    %79 = vector.broadcast %cst_40 : f32 to vector<16x1xf32>
    %80 = arith.divf %78, %79 : vector<16x1xf32>
    %81 = vector.broadcast %73 : vector<16x1xf32> to vector<16x32xf32>
    %82 = arith.subf %65, %81 : vector<16x32xf32>
    %cst_41 = arith.constant 9.99999996E-13 : f32
    %83 = vector.broadcast %cst_41 : f32 to vector<16x1xf32>
    %84 = arith.addf %80, %83 : vector<16x1xf32>
    %85 = math.rsqrt %84 : vector<16x1xf32>
    %86 = vector.broadcast %85 : vector<16x1xf32> to vector<16x32xf32>
    %87 = arith.mulf %82, %86 : vector<16x32xf32>
    %88 = vector.broadcast %67 : vector<1x32xf32> to vector<16x32xf32>
    %89 = arith.mulf %87, %88 : vector<16x32xf32>
    %90 = vector.broadcast %69 : vector<1x32xf32> to vector<16x32xf32>
    %91 = arith.addf %89, %90 : vector<16x32xf32>
    %92 = arith.truncf %91 : vector<16x32xf32> to vector<16x32xbf16>
    %c0_42 = arith.constant 0 : index
    %c0_43 = arith.constant 0 : index
    %c0_44 = arith.constant 0 : index
    %93 = vector.load %arg9[%c0_42, %c0_43, %c0_44] : memref<1x32x64xbf16, #tpu.memory_space<vmem>>, vector<1x32x64xbf16>
    %94 = vector.shape_cast %93 : vector<1x32x64xbf16> to vector<32x64xbf16>
    %cst_45 = arith.constant dense<0.000000e+00> : vector<16x64xf32>
    %95 = tpu.matmul %92, %94, %cst_45 {dimension_numbers = #tpu.dot_dimension_numbers<[1], [0], [0], [1], [0, 0, 1, 1], [], []>} : vector<16x32xbf16>, vector<32x64xbf16>, vector<16x64xf32> -> vector<16x64xf32>
    %c0_46 = arith.constant 0 : index
    %c0_47 = arith.constant 0 : index
    %c0_48 = arith.constant 0 : index
    %96 = vector.load %arg10[%c0_46, %c0_47, %c0_48] : memref<1x1x64xf32, #tpu.memory_space<vmem>>, vector<1x1x64xf32>
    %97 = vector.shape_cast %96 : vector<1x1x64xf32> to vector<1x64xf32>
    %98 = vector.broadcast %97 : vector<1x64xf32> to vector<16x64xf32>
    %99 = arith.addf %95, %98 : vector<16x64xf32>
    %cst_49 = arith.constant 5.000000e-01 : f32
    %100 = vector.broadcast %cst_49 : f32 to vector<16x64xf32>
    %101 = arith.mulf %100, %99 : vector<16x64xf32>
    %cst_50 = arith.constant 4.471500e-02 : f32
    %102 = vector.broadcast %cst_50 : f32 to vector<16x64xf32>
    %103 = arith.mulf %102, %99 : vector<16x64xf32>
    %104 = arith.mulf %103, %99 : vector<16x64xf32>
    %105 = arith.mulf %104, %99 : vector<16x64xf32>
    %106 = arith.addf %99, %105 : vector<16x64xf32>
    %cst_51 = arith.constant 0.797884583 : f32
    %107 = vector.broadcast %cst_51 : f32 to vector<16x64xf32>
    %108 = arith.mulf %107, %106 : vector<16x64xf32>
    %109 = math.tanh %108 : vector<16x64xf32>
    %cst_52 = arith.constant 1.000000e+00 : f32
    %110 = vector.broadcast %cst_52 : f32 to vector<16x64xf32>
    %111 = arith.addf %110, %109 : vector<16x64xf32>
    %112 = arith.mulf %101, %111 : vector<16x64xf32>
    %113 = arith.truncf %112 : vector<16x64xf32> to vector<16x64xbf16>
    %c0_53 = arith.constant 0 : index
    %c0_54 = arith.constant 0 : index
    %c0_55 = arith.constant 0 : index
    %114 = vector.load %arg11[%c0_53, %c0_54, %c0_55] : memref<1x64x32xbf16, #tpu.memory_space<vmem>>, vector<1x64x32xbf16>
    %115 = vector.shape_cast %114 : vector<1x64x32xbf16> to vector<64x32xbf16>
    %cst_56 = arith.constant dense<0.000000e+00> : vector<16x32xf32>
    %116 = tpu.matmul %113, %115, %cst_56 {dimension_numbers = #tpu.dot_dimension_numbers<[1], [0], [0], [1], [0, 0, 1, 1], [], []>} : vector<16x64xbf16>, vector<64x32xbf16>, vector<16x32xf32> -> vector<16x32xf32>
    %c0_57 = arith.constant 0 : index
    %c0_58 = arith.constant 0 : index
    %c0_59 = arith.constant 0 : index
    %117 = vector.load %arg12[%c0_57, %c0_58, %c0_59] : memref<1x1x32xf32, #tpu.memory_space<vmem>>, vector<1x1x32xf32>
    %118 = vector.shape_cast %117 : vector<1x1x32xf32> to vector<1x32xf32>
    %119 = vector.broadcast %118 : vector<1x32xf32> to vector<16x32xf32>
    %120 = arith.addf %116, %119 : vector<16x32xf32>
    %121 = arith.addf %120, %91 : vector<16x32xf32>
    %c0_60 = arith.constant 0 : index
    %c0_61 = arith.constant 0 : index
    %c0_62 = arith.constant 0 : index
    %122 = vector.load %arg13[%c0_60, %c0_61, %c0_62] : memref<1x1x32xf32, #tpu.memory_space<vmem>>, vector<1x1x32xf32>
    %123 = vector.shape_cast %122 : vector<1x1x32xf32> to vector<1x32xf32>
    %c0_63 = arith.constant 0 : index
    %c0_64 = arith.constant 0 : index
    %c0_65 = arith.constant 0 : index
    %124 = vector.load %arg14[%c0_63, %c0_64, %c0_65] : memref<1x1x32xf32, #tpu.memory_space<vmem>>, vector<1x1x32xf32>
    %125 = vector.shape_cast %124 : vector<1x1x32xf32> to vector<1x32xf32>
    %cst_66 = arith.constant dense<0.000000e+00> : vector<16xf32>
    %126 = vector.multi_reduction <add>, %121, %cst_66 [1] : vector<16x32xf32> to vector<16xf32>
    %127 = vector.shape_cast %126 : vector<16xf32> to vector<16x1xf32>
    %cst_67 = arith.constant 3.200000e+01 : f32
    %128 = vector.broadcast %cst_67 : f32 to vector<16x1xf32>
    %129 = arith.divf %127, %128 : vector<16x1xf32>
    %130 = vector.broadcast %129 : vector<16x1xf32> to vector<16x32xf32>
    %131 = arith.subf %121, %130 : vector<16x32xf32>
    %132 = arith.mulf %131, %131 : vector<16x32xf32>
    %cst_68 = arith.constant dense<0.000000e+00> : vector<16xf32>
    %133 = vector.multi_reduction <add>, %132, %cst_68 [1] : vector<16x32xf32> to vector<16xf32>
    %134 = vector.shape_cast %133 : vector<16xf32> to vector<16x1xf32>
    %cst_69 = arith.constant 3.200000e+01 : f32
    %135 = vector.broadcast %cst_69 : f32 to vector<16x1xf32>
    %136 = arith.divf %134, %135 : vector<16x1xf32>
    %137 = vector.broadcast %129 : vector<16x1xf32> to vector<16x32xf32>
    %138 = arith.subf %121, %137 : vector<16x32xf32>
    %cst_70 = arith.constant 9.99999996E-13 : f32
    %139 = vector.broadcast %cst_70 : f32 to vector<16x1xf32>
    %140 = arith.addf %136, %139 : vector<16x1xf32>
    %141 = math.rsqrt %140 : vector<16x1xf32>
    %142 = vector.broadcast %141 : vector<16x1xf32> to vector<16x32xf32>
    %143 = arith.mulf %138, %142 : vector<16x32xf32>
    %144 = vector.broadcast %123 : vector<1x32xf32> to vector<16x32xf32>
    %145 = arith.mulf %143, %144 : vector<16x32xf32>
    %146 = vector.broadcast %125 : vector<1x32xf32> to vector<16x32xf32>
    %147 = arith.addf %145, %146 : vector<16x32xf32>
    %c0_71 = arith.constant 0 : index
    %c0_72 = arith.constant 0 : index
    %148 = vector.load %arg16[%c0_71, %c0_72] : memref<16x32xf32, #tpu.memory_space<vmem>>, vector<16x32xf32>
    tpu.vector_store %arg16[%c0_71, %c0_72], %147 {strides = array<i32>} : memref<16x32xf32, #tpu.memory_space<vmem>>, vector<16x32xf32>,
    %c1_i32 = arith.constant 1 : i32
    %149 = arith.cmpi eq, %arg0, %c1_i32 : i32
    %150 = arith.extui %149 : i1 to i32
    %c0_i32_73 = arith.constant 0 : i32
    %151 = arith.cmpi ne, %150, %c0_i32_73 : i32
    scf.if %151 {
      %152 = vector.extract_strided_slice %147 {offsets = [0, 0], sizes = [1, 32], strides = [1, 1]} : vector<16x32xf32> to vector<1x32xf32>
      %153 = vector.extract_strided_slice %147 {offsets = [8, 0], sizes = [1, 32], strides = [1, 1]} : vector<16x32xf32> to vector<1x32xf32>
      %154 = tpu.concatenate %152, %153 in 0 : vector<1x32xf32>, vector<1x32xf32> -> vector<2x32xf32>
      %c0_74 = arith.constant 0 : index
      %c0_75 = arith.constant 0 : index
      %155 = vector.load %arg15[%c0_74, %c0_75] : memref<2x32xf32, #tpu.memory_space<vmem>>, vector<2x32xf32>
      tpu.vector_store %arg15[%c0_74, %c0_75], %154 {strides = array<i32>} : memref<2x32xf32, #tpu.memory_space<vmem>>, vector<2x32xf32>,
    } else {
    }
    return
  }
  func.func @transform_0(%arg0: i32) -> (i32, i32) {
    %c0_i32 = arith.constant 0 : i32
    %c0_i32_0 = arith.constant 0 : i32
    %c0_i32_1 = arith.constant 0 : i32
    return %c0_i32, %c0_i32_0 : i32, i32
  }
  func.func @transform_2(%arg0: i32) -> (i32, i32, i32) {
    %c0_i32 = arith.constant 0 : i32
    %c0_i32_0 = arith.constant 0 : i32
    %c0_i32_1 = arith.constant 0 : i32
    return %arg0, %c0_i32, %c0_i32_0 : i32, i32, i32
  }
  func.func @transform_3(%arg0: i32) -> (i32, i32, i32) {
    %c0_i32 = arith.constant 0 : i32
    %c0_i32_0 = arith.constant 0 : i32
    %c0_i32_1 = arith.constant 0 : i32
    return %arg0, %c0_i32, %c0_i32_0 : i32, i32, i32
  }
  func.func @transform_4(%arg0: i32) -> (i32, i32, i32) {
    %c0_i32 = arith.constant 0 : i32
    %c0_i32_0 = arith.constant 0 : i32
    %c0_i32_1 = arith.constant 0 : i32
    return %arg0, %c0_i32, %c0_i32_0 : i32, i32, i32
  }
  func.func @transform_5(%arg0: i32) -> (i32, i32, i32) {
    %c0_i32 = arith.constant 0 : i32
    %c0_i32_0 = arith.constant 0 : i32
    %c0_i32_1 = arith.constant 0 : i32
    return %arg0, %c0_i32, %c0_i32_0 : i32, i32, i32
  }
  func.func @transform_6(%arg0: i32) -> (i32, i32, i32) {
    %c0_i32 = arith.constant 0 : i32
    %c0_i32_0 = arith.constant 0 : i32
    %c0_i32_1 = arith.constant 0 : i32
    return %arg0, %c0_i32, %c0_i32_0 : i32, i32, i32
  }
  func.func @transform_7(%arg0: i32) -> (i32, i32, i32) {
    %c0_i32 = arith.constant 0 : i32
    %c0_i32_0 = arith.constant 0 : i32
    %c0_i32_1 = arith.constant 0 : i32
    return %arg0, %c0_i32, %c0_i32_0 : i32, i32, i32
  }
  func.func @transform_8(%arg0: i32) -> (i32, i32, i32) {
    %c0_i32 = arith.constant 0 : i32
    %c0_i32_0 = arith.constant 0 : i32
    %c0_i32_1 = arith.constant 0 : i32
    return %arg0, %c0_i32, %c0_i32_0 : i32, i32, i32
  }
  func.func @transform_9(%arg0: i32) -> (i32, i32, i32) {
    %c0_i32 = arith.constant 0 : i32
    %c0_i32_0 = arith.constant 0 : i32
    %c0_i32_1 = arith.constant 0 : i32
    return %arg0, %c0_i32, %c0_i32_0 : i32, i32, i32
  }
  func.func @transform_10(%arg0: i32) -> (i32, i32, i32) {
    %c0_i32 = arith.constant 0 : i32
    %c0_i32_0 = arith.constant 0 : i32
    %c0_i32_1 = arith.constant 0 : i32
    return %arg0, %c0_i32, %c0_i32_0 : i32, i32, i32
  }
  func.func @transform_11(%arg0: i32) -> (i32, i32, i32) {
    %c0_i32 = arith.constant 0 : i32
    %c0_i32_0 = arith.constant 0 : i32
    %c0_i32_1 = arith.constant 0 : i32
    return %arg0, %c0_i32, %c0_i32_0 : i32, i32, i32
  }
  func.func @transform_12(%arg0: i32) -> (i32, i32, i32) {
    %c0_i32 = arith.constant 0 : i32
    %c0_i32_0 = arith.constant 0 : i32
    %c0_i32_1 = arith.constant 0 : i32
    return %arg0, %c0_i32, %c0_i32_0 : i32, i32, i32
  }
  func.func @transform_13(%arg0: i32) -> (i32, i32, i32) {
    %c0_i32 = arith.constant 0 : i32
    %c0_i32_0 = arith.constant 0 : i32
    %c0_i32_1 = arith.constant 0 : i32
    return %arg0, %c0_i32, %c0_i32_0 : i32, i32, i32
  }
  func.func @transform_14(%arg0: i32) -> (i32, i32) {
    %c0_i32 = arith.constant 0 : i32
    %c0_i32_0 = arith.constant 0 : i32
    %c0_i32_1 = arith.constant 0 : i32
    return %c0_i32, %c0_i32_0 : i32, i32
  }
}

</mosaic_0001>

<bundles_post_ra>
// kernel: bert_classifier_forward.1
= control target key start
LH: loop header
LB: loop body
LE: loop exit
PB: predicated region body
PF: predicated region fallthrough
CT: control target
= control target key end

     0   :  { %s1812_s29 = smov 0   ;;  %s2022_s0 = inlined_call_operand.vmem [shape: f32[16,16], index: 0, kind: input, shape index: {}]   ;;  %s2023_s1 = inlined_call_operand.vmem [shape: f32[16,32], index: 1, kind: input, shape index: {}]   ;;  %s2024_s2 = inlined_call_operand.vmem [shape: bf16[2,32,96], index: 2, kind: input, shape index: {}]   ;;  %s2025_s3 = inlined_call_operand.vmem [shape: f32[2,1,96], index: 3, kind: input, shape index: {}]   ;;  %s2026_s4 = inlined_call_operand.vmem [shape: bf16[2,32,32], index: 4, kind: input, shape index: {}]   ;;  %s2027_s5 = inlined_call_operand.vmem [shape: f32[2,1,32], index: 5, kind: input, shape index: {}]   ;;  %s2028_s6 = inlined_call_operand.vmem [shape: f32[2,1,32], index: 6, kind: input, shape index: {}]   ;;  %s2029_s7 = inlined_call_operand.vmem [shape: f32[2,1,32], index: 7, kind: input, shape index: {}]   ;;  %s2030_s8 = inlined_call_operand.vmem [shape: bf16[2,32,64], index: 8, kind: input, shape index: {}]   ;;  %s2031_s9 = inlined_call_operand.vmem [shape: f32[2,1,64], index: 9, kind: input, shape index: {}]   ;;  %s2032_s10 = inlined_call_operand.vmem [shape: bf16[2,64,32], index: 10, kind: input, shape index: {}]   ;;  %s2033_s11 = inlined_call_operand.vmem [shape: f32[2,1,32], index: 11, kind: input, shape index: {}]   ;;  %s2034_s12 = inlined_call_operand.vmem [shape: f32[2,1,32], index: 12, kind: input, shape index: {}]   ;;  %s2035_s13 = inlined_call_operand.vmem [shape: f32[2,1,32], index: 13, kind: input, shape index: {}]   ;;  %s2036_s14 = inlined_call_operand.vmem [shape: f32[2,32], index: 14, kind: output, shape index: {}]  }
   0x1   :  { %2040 = sst [smem:[#allocation8_spill]] %s2022_s0 }
   0x2   :  { %2041 = sst [smem:[#allocation9_spill]] %s2023_s1 }
   0x3   :  { %2042 = sst [smem:[#allocation10_spill]] %s2024_s2 }
   0x4   :  { %2043 = sst [smem:[#allocation11_spill]] %s2026_s4 }
   0x5   :  { %2044 = sst [smem:[#allocation12_spill]] %s2036_s14 }
   0x6 LB: > { %2045 = sst [smem:[#allocation7_spill]] %s1728_s29  ;;  %s1818_s30 = sadd.s32 4294967295, %s1728_s29   ;;  %s1728_s29 = sphi %s1812_s29, %s24_s29  }
   0x7   : > { %p1529_p0 = scmp.ge.s32.totalorder %s1728_s29, 1  ;;  %p477_p1 = scmp.lt.s32.totalorder %s1728_s29, 3 }
   0x9   : > { %p478_p2 = pnand %p1529_p0, %p477_p1 }
   0xa   : > { %p555_p3 = scmp.lt.s32.totalorder (!%p478_p2), %s1818_s30, 1  ;;  %s2046_s2 = sld [smem:[#allocation10_spill]] (!%p478_p2) }
   0xb   : > { %481 = sbr.rel (%p478_p2) target bundleno = 2350 (0x92e), region = 72  ;;  %s2047_s4 = sld [smem:[#allocation11_spill]] (!%p478_p2) }
   0xc   : > { %p1538_p4 = scmp.ne.s32.totalorder (!%p478_p2), %s1818_s30, 0 }
  0x10   : > { %s1824_s15 = scalar_select %p555_p3, %s1818_s30, 1 }
  0x11   : > { %s2048_s26 = sld [smem:[#allocation9_spill]] (!%p1538_p4) }
  0x12   : > { %s1573_s16 = sshll.u32 %s1824_s15, 4  ;;  %s592_s1 = scalar_lea.vmem %s2033_s11, %s1824_s15 }
  0x13   : > { %s559_s22 = scalar_lea.vmem %s2046_s2, %s1573_s16  ;;  %s1837_s25 = scalar_lea.vmem %s2047_s4, %s1573_s16 }
  0x14   : > { %s1854_s21 = scalar_lea.vmem %s2030_s8, %s1573_s16  ;;  %s584_s2 = scalar_lea.vmem %s2031_s9, %s1824_s15 }
  0x15   : > { %s1576_s4 = sshll.u32 %s1824_s15, 5  ;;  %s595_s19 = scalar_lea.vmem %s2034_s12, %s1824_s15 }
  0x16   : > { %s1864_s28 = scalar_lea.vmem %s2032_s10, %s1576_s4  ;;  %s598_s0 = scalar_lea.vmem %s2035_s13, %s1824_s15 }
  0x17   : > { %603 = sbr.rel (%p1538_p4) target bundleno = 33 (0x21), region = 76 }
  0x1c   : > { %v637_v0 = vld [vmem:[%s2048_s26] sm:$0xff]  ;;  %v639_v1 = vld [vmem:[%s2048_s26 + $0x8] sm:$0xff] }
  0x1d   : > { %638 = vst [vmem:[#allocation2] sm:$0xff] %v637_v0  ;;  %640 = vst [vmem:[#allocation2 + $0x8] sm:$0xff] %v639_v1 }
  0x1e   : > { %648 = vsyncadd [#allocation4], 256 }
  0x1f   : > { %1724 = dma.done.wait [#allocation4], 256 }
  0x20   : > { %1725 = vsyncadd [#allocation4], 4294967040 }
  0x21 PF: > { %v1681_v2 = vld [vmem:[%s559_s22 + $0x8] sm:$0xff]   ;;  %v1730_v3 = vmov 0.0   ;;  %v1682_v4 = vld [vmem:[%s559_s22] sm:$0xff]   ;;  %vm1731_vm0 = vmmov 0   ;;  %vm678_vm1 = vcmask 261120   ;;  %s2049_s14 = scalar_lea.vmem %s2025_s3, %s1824_s15  ;;  %vm731_vm2 = vcmask 781312   ;;  %s2053_s4 = scalar_lea.vmem %s2029_s7, %s1824_s15 }
  0x22   : > { %1602 = vmatprep.subr.bf16.mxu1 %v1730_v3  ;;  %1616 = vmatprep.subr.bf16.mxu0 %v1730_v3  ;;  %v1539_v8 = vld [vmem:[%s2049_s14] ss:$0 sm:$0xff]  ;;  %s1732_s29 = smov 112   ;;  %s1733_s17 = smov 96   ;;  %vm749_vm3 = vcmask 130048   ;;  %vm1272_vm4 = vcmask 523264  }
  0x23   : > { %1603 = vmatpush3.bf16.msra.mxu1 %v1681_v2  ;;  %1606 = vmatprep.mubr.msk.bf16.mxu1 %vm1731_vm0, %v1730_v3  ;;  %s1734_s16 = smov 80   ;;  %s2050_s24 = sld [smem:[#allocation8_spill]] }
  0x24   : > { %v1889_v5 = vld [vmem:[#allocation2] sm:$0xff]  ;;  %v1891_v6 = vld [vmem:[#allocation2 + $0x8] sm:$0xff]  ;;  %1604 = vmatprep.subr.bf16.mxu1 %v1730_v3  ;;  %1618 = vmatprep.mubr.msk.bf16.mxu0 %vm1731_vm0, %v1730_v3  ;;  %s1735_s22 = smov 48   ;;  %s1736_s18 = smov 64  }
  0x25   : > { %v654_v7 = vpack.c.bf16 %v1891_v6, %v1889_v5  ;;  %p1569_p5 = scmp.ne.s32.totalorder %s1818_s30, 1 }
  0x27   : > { %1605 = vmatpush3.bf16.msra.mxu1 %v1682_v4 }
  0x28   : > { %1610 = vmatprep.subr.bf16.mxu1 %v1730_v3 }
  0x29   : > { %v736_v23 = vld [vmem:[%s2050_s24] sm:$0xff]  ;;  %v737_v27 = vld [vmem:[%s2050_s24 + $0x8] sm:$0xff] }
  0x2a   : > { %1607 = vmatmul.mubr.msk.bf16.vlgmr.msra.gmra.mxu1 %vm678_vm1, %v654_v7 }
  0x2b   : > { %1612 = vmatprep.mubr.msk.bf16.mxu1 %vm1731_vm0, %v1730_v3 }
  0xea   : > { %v716_v9 = vpop.f32.mrf.mxu1 }
  0xeb   : > { %v717_v10 = vadd.f32 %v1539_v8, %v716_v9 }
  0xec   : > { %v1608_v11 = vpop.f32.mrf.mxu1 }
  0xed   : > { %v1577_v12 = vpack.c.bf16 %v717_v10, %v717_v10 }
  0xee   : > { %v719_v13 = vpop.f32.mrf.mxu1 }
  0xef   : > { %732 = vst.msk [vmem:[#allocation3] sm:$0xf] %vm731_vm2, %v1577_v12  ;;  %v720_v14 = vadd.f32 %v1539_v8, %v719_v13 }
  0xf0   : > { %v1609_v15 = vpop.f32.mrf.mxu1 }
  0xf1   : > { %v1578_v16 = vpack.c.bf16 %v720_v14, %v720_v14 }
  0xf3   : > { %733 = vst.msk [vmem:[#allocation3 + $0x4] sm:$0xf] %vm731_vm2, %v1578_v16  ;;  %v1684_v16 = vld [vmem:[%s1837_s25] sm:$0xff]  }
  0xfa   : > { %v1907_v17 = vld [vmem:[#allocation3] sm:$0xff]  }
  0xfb   : > { %868 = vrot.lane.b32.xlu1 %v1907_v17, %s1732_s29  ;;  %747 = vrot.lane.b32.xlu0 %v1907_v17, %s1733_s17  ;;  %s2051_s29 = scalar_lea.vmem %s2027_s5, %s1824_s15 }
  0xff   : > { %870 = vrot.lane.b32.xlu0 %v1907_v17, %s1734_s16 }
 0x16d   : > { %v748_v18 = vpop.permute.xlu0 %747  ;;  %v869_v22 = vpop.permute.xlu1 %868 }
 0x16e   : > { %v754_v19 = vsel %vm749_vm3, %v748_v18, 0 }
 0x16f   : > { %1611 = vmatpush3.bf16.xpose.msra.mxu1 %v754_v19 }
 0x170   : > { %1622 = vmatprep.subr.bf16.mxu1 %v1730_v3 }
 0x171   : > { %v871_v20 = vpop.permute.xlu0 %870 }
 0x172   : > { %v876_v21 = vsel %vm749_vm3, %v871_v20, 0 }
 0x176   : > { %1613 = vmatmul.mubr.msk.bf16.vlgmr.msra.gmra.mxu1 %vm749_vm3, %v1907_v17 }
 0x177   : > { %1623 = vmatpush3.bf16.xpose.msra.mxu1 %v876_v21  ;;  %1624 = vmatprep.mubr.msk.bf16.mxu1 %vm1731_vm0, %v1730_v3 }
 0x178   : > { %1634 = vmatprep.subr.bf16.mxu1 %v1730_v3 }
 0x17e   : > { %1625 = vmatmul.mubr.msk.bf16.vlgmr.msra.gmra.mxu1 %vm749_vm3, %v869_v22 }
 0x17f   : > { %1636 = vmatprep.mubr.msk.bf16.mxu1 %vm1731_vm0, %v1730_v3 }
 0x236   : > { %v790_v24 = vpop.f32.mrf.mxu1 }
 0x237   : > { %v791_v25 = vadd.f32 %v790_v24, %v736_v23 }
 0x238   : > { %v1614_v26 = vpop.f32.mrf.mxu1 }
 0x239   : > { %v797_v28 = vsel %vm749_vm3, %v791_v25, -inf }
 0x23a   : > { %798 = vmax.xlane.f32.xlu1 %v797_v28  ;;  %v793_v29 = vpop.f32.mrf.mxu1 }
 0x23b   : > { %v794_v30 = vadd.f32 %v793_v29, %v737_v27 }
 0x23c   : > { %v1615_v31 = vpop.f32.mrf.mxu1 }
 0x23d   : > { %v800_v32 = vsel %vm749_vm3, %v794_v30, -inf }
 0x23e   : > { %801 = vmax.xlane.f32.xlu0 %v800_v32  ;;  %v912_v33 = vpop.f32.mrf.mxu1 }
 0x23f   : > { %v913_v34 = vadd.f32 %v912_v33, %v736_v23  ;;  %v1554_v33 = vld [vmem:[%s2051_s29] ss:$0 sm:$0xff] }
 0x240   : > { %v1626_v35 = vpop.f32.mrf.mxu1 }
 0x241   : > { %v919_v36 = vsel %vm749_vm3, %v913_v34, -inf }
 0x242   : > { %920 = vmax.xlane.f32.xlu0 %v919_v36  ;;  %v915_v37 = vpop.f32.mrf.mxu1 }
 0x243   : > { %v916_v38 = vadd.f32 %v915_v37, %v737_v27 }
 0x244   : > { %v1627_v39 = vpop.f32.mrf.mxu1 }
 0x245   : > { %v922_v40 = vsel %vm749_vm3, %v916_v38, -inf }
 0x246   : > { %923 = vmax.xlane.f32.xlu1 %v922_v40 }
 0x2c3   : > { %v799_v41 = vpop.xlane.xlu1 %798 }
 0x2c4   : > { %v803_v42 = vsub.f32 %v791_v25, %v799_v41 }
 0x2c6   : > { %v805_v43 = vmul.f32 1.442695, %v803_v42 }
 0x2c7   : > { %v802_v44 = vpop.xlane.xlu0 %801 }
 0x2c8   : > { %1692 = vpow2.f32 %v805_v43  ;;  %v804_v45 = vsub.f32 %v794_v30, %v802_v44 }
 0x2ca   : > { %v807_v46 = vmul.f32 1.442695, %v804_v45 }
 0x2cb   : > { %v921_v47 = vpop.xlane.xlu0 %920 }
 0x2cc   : > { %1694 = vpow2.f32 %v807_v46  ;;  %v925_v48 = vsub.f32 %v913_v34, %v921_v47 }
 0x2ce   : > { %v927_v49 = vmul.f32 1.442695, %v925_v48 }
 0x2cf   : > { %v924_v50 = vpop.xlane.xlu1 %923 }
 0x2d0   : > { %1696 = vpow2.f32 %v927_v49  ;;  %v926_v51 = vsub.f32 %v916_v38, %v924_v50 }
 0x2d2   : > { %v929_v52 = vmul.f32 1.442695, %v926_v51 }
 0x2d4   : > { %1698 = vpow2.f32 %v929_v52 }
 0x2d5   : > { %v1693_v53 = vpop.eup %1692 }
 0x2d6   : > { %v809_v54 = vsel %vm749_vm3, %v1693_v53, 0.0 }
 0x2d7   : > { %810 = vadd.xlane.f32.xlu0 %v809_v54  ;;  %v1687_v54 = vld [vmem:[%s1854_s21] sm:$0xff]  }
 0x2d9   : > { %v1695_v55 = vpop.eup %1694 }
 0x2da   : > { %v812_v56 = vsel %vm749_vm3, %v1695_v55, 0.0 }
 0x2db   : > { %813 = vadd.xlane.f32.xlu1 %v812_v56 }
 0x2dd   : > { %v1697_v57 = vpop.eup %1696 }
 0x2de   : > { %v931_v58 = vsel %vm749_vm3, %v1697_v57, 0.0 }
 0x2df   : > { %932 = vadd.xlane.f32.xlu0 %v931_v58 }
 0x2e1   : > { %v1699_v59 = vpop.eup %1698 }
 0x2e2   : > { %v934_v60 = vsel %vm749_vm3, %v1699_v59, 0.0 }
 0x2e3   : > { %935 = vadd.xlane.f32.xlu1 %v934_v60 }
 0x2f4   : > { %942 = vrot.lane.b32.xlu1 %v1907_v17, %s1735_s22 }
 0x2f5   : > { %820 = vrot.lane.b32.xlu0 %v1907_v17, %s1736_s18  ;;  %v1685_v17 = vld [vmem:[%s1837_s25 + $0x8] sm:$0xff]  }
 0x2f6   : > { %1635 = vmatpush3.bf16.msra.mxu1 %v1685_v17 }
 0x2f7   : > { %1646 = vmatprep.subr.bf16.mxu1 %v1730_v3 }
 0x360   : > { %v811_v61 = vpop.xlane.xlu0 %810 }
 0x361   : > { %1700 = vrcp.f32 %v811_v61 }
 0x364   : > { %v814_v62 = vpop.xlane.xlu1 %813 }
 0x365   : > { %1702 = vrcp.f32 %v814_v62 }
 0x368   : > { %v933_v63 = vpop.xlane.xlu0 %932 }
 0x369   : > { %1704 = vrcp.f32 %v933_v63 }
 0x36c   : > { %v821_v0 = vpop.permute.xlu0 %820  ;;  %v936_v1 = vpop.xlane.xlu1 %935 }
 0x36d   : > { %1706 = vrcp.f32 %v936_v1  ;;  %1617 = vmatpush3.bf16.msra.mxu0 %v821_v0 }
 0x36e   : > { %1628 = vmatprep.subr.bf16.mxu0 %v1730_v3  ;;  %v1701_v2 = vpop.eup %1700 }
 0x36f   : > { %v817_v7 = vmul.f32 %v1701_v2, %v1693_v53 }
 0x370   : > { %v943_v10 = vpop.permute.xlu1 %942 }
 0x372   : > { %v1703_v4 = vpop.eup %1702 }
 0x373   : > { %v818_v8 = vmul.f32 %v1703_v4, %v1695_v55  ;;  %v1556_v4 = vld [vmem:[%s2053_s4] ss:$0 sm:$0xff] }
 0x375   : > { %v819_v9 = vpack.c.bf16 %v818_v8, %v817_v7 }
 0x376   : > { %v1705_v11 = vpop.eup %1704 }
 0x377   : > { %1619 = vmatmul.mubr.msk.bf16.vlgmr.msra.gmra.mxu0 %vm749_vm3, %v819_v9  ;;  %v939_v13 = vmul.f32 %v1705_v11, %v1697_v57  ;;  %v1688_v11 = vld [vmem:[%s1864_s28 + $0x18] sm:$0xff]  }
 0x378   : > { %1629 = vmatpush3.bf16.msra.mxu0 %v943_v10  ;;  %1630 = vmatprep.mubr.msk.bf16.mxu0 %vm1731_vm0, %v1730_v3 }
 0x379   : > { %1640 = vmatprep.subr.bf16.mxu0 %v1730_v3 }
 0x37a   : > { %v1707_v12 = vpop.eup %1706 }
 0x37b   : > { %v940_v14 = vmul.f32 %v1707_v12, %v1699_v59  ;;  %v1689_v12 = vld [vmem:[%s1864_s28 + $0x10] sm:$0xff]  }
 0x37d   : > { %v941_v15 = vpack.c.bf16 %v940_v14, %v939_v13  ;;  %v1690_v13 = vld [vmem:[%s1864_s28 + $0x8] sm:$0xff]   ;;  %v1691_v14 = vld [vmem:[%s1864_s28] sm:$0xff]  }
 0x37f   : > { %1631 = vmatmul.mubr.msk.bf16.vlgmr.msra.gmra.mxu0 %vm749_vm3, %v941_v15  ;;  %v1557_v15 = vld [vmem:[%s584_s2] ss:$0 sm:$0xff] }
 0x380   : > { %1642 = vmatprep.mubr.msk.bf16.mxu0 %vm1731_vm0, %v1730_v3  ;;  %1641 = vmatpush3.bf16.msra.mxu0 %v1684_v16 }
 0x381   : > { %1654 = vmatprep.subr.bf16.mxu0 %v1730_v3 }
 0x437   : > { %v860_v18 = vpop.f32.mrf.mxu0 }
 0x439   : > { %v1620_v19 = vpop.f32.mrf.mxu0 }
 0x43b   : > { %v863_v20 = vpop.f32.mrf.mxu0 }
 0x43c   : > { %v867_v21 = vpack.c.bf16 %v863_v20, %v860_v18 }
 0x43d   : > { %v1621_v22 = vpop.f32.mrf.mxu0 }
 0x43e   : > { %1643 = vmatmul.mubr.msk.bf16.vlgmr.msra.gmra.mxu0 %vm749_vm3, %v867_v21 }
 0x43f   : > { %v982_v23 = vpop.f32.mrf.mxu0  ;;  %1662 = vmatprep.mubr.msk.bf16.mxu0 %vm1731_vm0, %v1730_v3  ;;  %1655 = vmatpush3.bf16.msra.mxu0 %v1688_v11 }
 0x440   : > { %1656 = vmatprep.subr.bf16.mxu0 %v1730_v3 }
 0x441   : > { %v1632_v24 = vpop.f32.mrf.mxu0 }
 0x443   : > { %v985_v25 = vpop.f32.mrf.mxu0  ;;  %1657 = vmatpush3.bf16.msra.mxu0 %v1689_v12 }
 0x444   : > { %v989_v26 = vpack.c.bf16 %v985_v25, %v982_v23  ;;  %1658 = vmatprep.subr.bf16.mxu0 %v1730_v3 }
 0x445   : > { %v1633_v27 = vpop.f32.mrf.mxu0 }
 0x446   : > { %1637 = vmatmul.mubr.msk.bf16.vlgmr.msra.gmra.mxu1 %vm749_vm3, %v989_v26 }
 0x447   : > { %1650 = vmatprep.mubr.msk.bf16.mxu1 %vm1731_vm0, %v1730_v3  ;;  %1659 = vmatpush3.bf16.msra.mxu0 %v1690_v13 }
 0x448   : > { %1660 = vmatprep.subr.bf16.mxu0 %v1730_v3 }
 0x44b   : > { %1661 = vmatpush3.bf16.msra.mxu0 %v1691_v14 }
 0x4fe   : > { %v1083_v28 = vpop.f32.mrf.mxu0 }
 0x500   : > { %v1644_v29 = vpop.f32.mrf.mxu0 }
 0x502   : > { %v1086_v30 = vpop.f32.mrf.mxu0 }
 0x504   : > { %v1645_v31 = vpop.f32.mrf.mxu0 }
 0x506   : > { %v1033_v32 = vpop.f32.mrf.mxu1 }
 0x507   : > { %v1084_v34 = vadd.f32 %v1083_v28, %v1033_v32 }
 0x508   : > { %v1638_v35 = vpop.f32.mrf.mxu1 }
 0x509   : > { %v1097_v36 = vadd.f32 %v1554_v33, %v1084_v34 }
 0x50a   : > { %v1036_v37 = vpop.f32.mrf.mxu1 }
 0x50b   : > { %v1087_v38 = vadd.f32 %v1086_v30, %v1036_v37  ;;  %v1099_v39 = vadd.f32 %v1097_v36, %v1889_v5 }
 0x50c   : > { %v1639_v40 = vpop.f32.mrf.mxu1 }
 0x50d   : > { %v1098_v41 = vadd.f32 %v1554_v33, %v1087_v38  ;;  %v1103_v42 = vsel %vm678_vm1, %v1099_v39, 0.0  ;;  %v1561_v40 = vld [vmem:[%s592_s1] ss:$0 sm:$0xff] }
 0x50e   : > { %1104 = vadd.xlane.f32.xlu1 %v1103_v42 }
 0x50f   : > { %v1100_v43 = vadd.f32 %v1098_v41, %v1891_v6  ;;  %v1686_v6 = vld [vmem:[%s1854_s21 + $0x8] sm:$0xff]   ;;  %s2052_s21 = scalar_lea.vmem %s2028_s6, %s1824_s15 }
 0x510   : > { %1647 = vmatpush3.bf16.msra.mxu1 %v1686_v6  ;;  %v1555_v63 = vld [vmem:[%s2052_s21] ss:$0 sm:$0xff] }
 0x511   : > { %v1106_v44 = vsel %vm678_vm1, %v1100_v43, 0.0  ;;  %1648 = vmatprep.subr.bf16.mxu1 %v1730_v3 }
 0x512   : > { %1107 = vadd.xlane.f32.xlu0 %v1106_v44 }
 0x514   : > { %1649 = vmatpush3.bf16.msra.mxu1 %v1687_v54 }
 0x597   : > { %v1105_v45 = vpop.xlane.xlu1 %1104 }
 0x598   : > { %v1110_v46 = vmul.f32 0.03125, %v1105_v45 }
 0x59a   : > { %v1112_v47 = vsub.f32 %v1099_v39, %v1110_v46 }
 0x59b   : > { %v1108_v48 = vpop.xlane.xlu0 %1107 }
 0x59c   : > { %v1111_v49 = vmul.f32 0.03125, %v1108_v48  ;;  %v1114_v50 = vmul.f32 %v1112_v47, %v1112_v47 }
 0x59e   : > { %v1113_v51 = vsub.f32 %v1100_v43, %v1111_v49  ;;  %v1116_v5 = vsel %vm678_vm1, %v1114_v50, 0.0 }
 0x59f   : > { %1117 = vadd.xlane.f32.xlu0 %v1116_v5 }
 0x5a0   : > { %v1115_v52 = vmul.f32 %v1113_v51, %v1113_v51 }
 0x5a2   : > { %v1119_v53 = vsel %vm678_vm1, %v1115_v52, 0.0 }
 0x5a3   : > { %1120 = vadd.xlane.f32.xlu1 %v1119_v53 }
 0x628   : > { %v1118_v55 = vpop.xlane.xlu0 %1117 }
 0x629   : > { %v1122_v56 = vmul.f32 0.03125, %v1118_v55 }
 0x62b   : > { %v1124_v57 = vadd.f32 1e-12, %v1122_v56 }
 0x62c   : > { %v1121_v58 = vpop.xlane.xlu1 %1120 }
 0x62d   : > { %1708 = vrsqrt.f32 %v1124_v57  ;;  %v1123_v59 = vmul.f32 0.03125, %v1121_v58 }
 0x62f   : > { %v1125_v60 = vadd.f32 1e-12, %v1123_v59 }
 0x631   : > { %1710 = vrsqrt.f32 %v1125_v60 }
 0x63a   : > { %v1709_v61 = vpop.eup %1708 }
 0x63b   : > { %v1128_v62 = vmul.f32 %v1709_v61, %v1112_v47 }
 0x63d   : > { %v1136_v2 = vmul.f32 %v1555_v63, %v1128_v62 }
 0x63e   : > { %v1711_v0 = vpop.eup %1710 }
 0x63f   : > { %v1129_v1 = vmul.f32 %v1711_v0, %v1113_v51  ;;  %v1144_v8 = vadd.f32 %v1556_v4, %v1136_v2  ;;  %v1567_v2 = vld [vmem:[%s595_s19] ss:$0 sm:$0xff] }
 0x641   : > { %v1137_v7 = vmul.f32 %v1555_v63, %v1129_v1 }
 0x643   : > { %v1145_v9 = vadd.f32 %v1556_v4, %v1137_v7  ;;  %v1568_v7 = vld [vmem:[%s598_s0] ss:$0 sm:$0xff]  ;;  %s2054_s0 = sld [smem:[#allocation12_spill]] (!%p1569_p5) }
 0x645   : > { %v1146_v10 = vpack.c.bf16 %v1145_v9, %v1144_v8 }
 0x647   : > { %1651 = vmatmul.mubr.msk.bf16.vlgmr.msra.gmra.mxu1 %vm678_vm1, %v1146_v10 }
 0x707   : > { %v1207_v16 = vpop.f32.mrf.mxu1 }
 0x708   : > { %v1208_v17 = vadd.f32 %v1557_v15, %v1207_v16 }
 0x709   : > { %v1652_v18 = vpop.f32.mrf.mxu1 }
 0x70a   : > { %v1216_v19 = vmul.f32 0.044715, %v1208_v17  ;;  %v1214_v34 = vmul.f32 0.5, %v1208_v17 }
 0x70b   : > { %v1210_v20 = vpop.f32.mrf.mxu1 }
 0x70c   : > { %v1218_v21 = vmul.f32 %v1216_v19, %v1208_v17  ;;  %v1211_v22 = vadd.f32 %v1557_v15, %v1210_v20 }
 0x70d   : > { %v1653_v23 = vpop.f32.mrf.mxu1 }
 0x70e   : > { %v1220_v24 = vmul.f32 %v1218_v21, %v1208_v17  ;;  %v1217_v25 = vmul.f32 0.044715, %v1211_v22  ;;  %v1215_v35 = vmul.f32 0.5, %v1211_v22 }
 0x710   : > { %v1222_v26 = vadd.f32 %v1220_v24, %v1208_v17  ;;  %v1219_v27 = vmul.f32 %v1217_v25, %v1211_v22 }
 0x712   : > { %v1224_v28 = vmul.f32 0.7978846, %v1222_v26  ;;  %v1221_v3 = vmul.f32 %v1219_v27, %v1211_v22 }
 0x714   : > { %1712 = vtanh.f32 %v1224_v28  ;;  %v1223_v29 = vadd.f32 %v1221_v3, %v1211_v22 }
 0x716   : > { %v1225_v30 = vmul.f32 0.7978846, %v1223_v29 }
 0x718   : > { %1714 = vtanh.f32 %v1225_v30 }
 0x721   : > { %v1713_v31 = vpop.eup %1712 }
 0x722   : > { %v1228_v32 = vadd.f32 1.0, %v1713_v31 }
 0x724   : > { %v1230_v37 = vmul.f32 %v1228_v32, %v1214_v34 }
 0x725   : > { %v1715_v33 = vpop.eup %1714 }
 0x726   : > { %v1229_v36 = vadd.f32 1.0, %v1715_v33 }
 0x728   : > { %v1231_v38 = vmul.f32 %v1229_v36, %v1215_v35 }
 0x72a   : > { %v1232_v39 = vpack.c.bf16 %v1231_v38, %v1230_v37 }
 0x72c   : > { %1663 = vmatmul.mubr.msk.bf16.vlgmr.msra.gmra.mxu0 %vm1272_vm4, %v1232_v39 }
 0x7ec   : > { %v1310_v41 = vpop.f32.mrf.mxu0 }
 0x7ed   : > { %v1311_v42 = vadd.f32 %v1561_v40, %v1310_v41 }
 0x7ee   : > { %v1664_v43 = vpop.f32.mrf.mxu0 }
 0x7ef   : > { %v1317_v44 = vadd.f32 %v1311_v42, %v1144_v8 }
 0x7f0   : > { %v1313_v45 = vpop.f32.mrf.mxu0 }
 0x7f1   : > { %v1314_v46 = vadd.f32 %v1561_v40, %v1313_v45  ;;  %v1321_v47 = vsel %vm678_vm1, %v1317_v44, 0.0 }
 0x7f2   : > { %1322 = vadd.xlane.f32.xlu0 %v1321_v47  ;;  %v1665_v48 = vpop.f32.mrf.mxu0 }
 0x7f3   : > { %v1318_v49 = vadd.f32 %v1314_v46, %v1145_v9 }
 0x7f5   : > { %v1324_v50 = vsel %vm678_vm1, %v1318_v49, 0.0 }
 0x7f6   : > { %1325 = vadd.xlane.f32.xlu1 %v1324_v50 }
 0x87b   : > { %v1323_v51 = vpop.xlane.xlu0 %1322 }
 0x87c   : > { %v1327_v5 = vmul.f32 0.03125, %v1323_v51 }
 0x87e   : > { %v1329_v52 = vsub.f32 %v1317_v44, %v1327_v5 }
 0x87f   : > { %v1326_v53 = vpop.xlane.xlu1 %1325 }
 0x880   : > { %v1328_v6 = vmul.f32 0.03125, %v1326_v53  ;;  %v1331_v54 = vmul.f32 %v1329_v52, %v1329_v52 }
 0x882   : > { %v1330_v55 = vsub.f32 %v1318_v49, %v1328_v6  ;;  %v1333_v56 = vsel %vm678_vm1, %v1331_v54, 0.0 }
 0x883   : > { %1334 = vadd.xlane.f32.xlu0 %v1333_v56 }
 0x884   : > { %v1332_v57 = vmul.f32 %v1330_v55, %v1330_v55 }
 0x886   : > { %v1336_v58 = vsel %vm678_vm1, %v1332_v57, 0.0 }
 0x887   : > { %1337 = vadd.xlane.f32.xlu1 %v1336_v58 }
 0x90c   : > { %v1335_v59 = vpop.xlane.xlu0 %1334 }
 0x90d   : > { %v1339_v60 = vmul.f32 0.03125, %v1335_v59 }
 0x90f   : > { %v1341_v61 = vadd.f32 1e-12, %v1339_v60 }
 0x910   : > { %v1338_v62 = vpop.xlane.xlu1 %1337 }
 0x911   : > { %1716 = vrsqrt.f32 %v1341_v61  ;;  %v1340_v63 = vmul.f32 0.03125, %v1338_v62 }
 0x913   : > { %v1342_v0 = vadd.f32 1e-12, %v1340_v63 }
 0x915   : > { %1718 = vrsqrt.f32 %v1342_v0 }
 0x91e   : > { %v1717_v1 = vpop.eup %1716 }
 0x91f   : > { %v1345_v4 = vmul.f32 %v1717_v1, %v1329_v52 }
 0x921   : > { %v1353_v8 = vmul.f32 %v1567_v2, %v1345_v4 }
 0x922   : > { %v1719_v9 = vpop.eup %1718 }
 0x923   : > { %v1361_v10 = vadd.f32 %v1568_v7, %v1353_v8  ;;  %v1346_v11 = vmul.f32 %v1719_v9, %v1330_v55 }
 0x925   : > { %1363 = vst.msk [vmem:[#allocation2] sm:$0xff] %vm678_vm1, %v1361_v10  ;;  %v1354_v12 = vmul.f32 %v1567_v2, %v1346_v11  ;;  %1368 = sbr.rel (%p1569_p5) target bundleno = 2350 (0x92e), region = 114 }
 0x927   : > { %v1362_v13 = vadd.f32 %v1568_v7, %v1354_v12 }
 0x929   : > { %1364 = vst.msk [vmem:[#allocation2 + $0x8] sm:$0xff] %vm678_vm1, %v1362_v13 }
 0x92a   : > { %v1370_v14 = vrot.slane %v1362_v13, 7  ;;  %vm1372_vm5 = vcmask 1040384   ;;  %vm1374_vm6 = vcmask 254976  }
 0x92c   : > { %v1373_v15 = vsel %vm1372_vm5, %v1361_v10, %v1370_v14 }
 0x92d   : > { %1375 = vst.msk [vmem:[%s2054_s0] sm:$0x3] %vm1374_vm6, %v1373_v15 }
 0x92e PF: > { %s2055_s29 = sld [smem:[#allocation7_spill]] }
 0x934   : > { %s24_s29 = sadd.s32 1, %s2055_s29  }
 0x935   : > { %p21_p6 = scmp.ge.s32.totalorder %s24_s29, 4  }
 0x937   :  { %23 = sbr.rel (!%p21_p6) target bundleno = 6 (0x6), region = 181 }
 0x93c   :  { %1387 = vsyncmov [#allocation4] }
 0x93f   :  { %s1388_s17 = vpop.sfrf %1387 }
 0x940   :  { %p1572_p7 = scmp.ne.s32.totalorder %s1388_s17, 0 }
 0x942   :  { %1392 = shalt.err (%p1572_p7)  }

</bundles_post_ra>
